<compile_context>
chip_gen: v6e
topology: v6e:2x2x1
jax: 0.10.0
libtpu: 0.0.40
codegen_flags: <defaults>
</compile_context>

<pallas_src>
import jax
import jax.numpy as jnp
from jax.experimental import pallas as pl
from jax.experimental.pallas import tpu as pltpu

_N_PAD_W = 128   # lane-dense weight width fed to the MXU
_N_PAD_OUT = 8   # narrow output slab; real class scores live in columns [:2]


def _round_up(x, m):
    return -(-x // m) * m


def _cdiv(a, b):
    return -(-a // b)


def _classifier_kernel(x_ref, w_ref, b_ref, o_ref):
    # x: (TM, 512) bf16   w: (512, 128) bf16   b: (1, 8) f32   o: (TM, 8) bf16
    y = jnp.dot(x_ref[...], w_ref[...], preferred_element_type=jnp.float32)
    y = y[:, :_N_PAD_OUT] + b_ref[...]                      # f32 bias add, 8 lanes
    # sigmoid(y) = 0.5*tanh(0.5*y) + 0.5 : one EUP transcendental per element.
    o_ref[...] = (0.5 * jnp.tanh(0.5 * y) + 0.5).astype(o_ref.dtype)


def fold_classifier_params(w1, b1, w2, b2):
    """Fold Linear(512,256) -> Dropout(eval: identity) -> Linear(256,2) into one
    affine map, pad it lane-dense, cast the weight to bf16.  Call ONCE at
    parameter-load time; the forward pass reuses the result every call."""
    d_in, n_out = w1.shape[0], w2.shape[1]
    w_fused = jnp.dot(w1, w2, preferred_element_type=jnp.float32)       # (512, 2)
    b_fused = jnp.dot(b1, w2, preferred_element_type=jnp.float32) + b2  # (1, 2)
    w_pad = jnp.zeros((d_in, _N_PAD_W), jnp.float32).at[:, :n_out].set(w_fused)
    b_pad = jnp.zeros((1, _N_PAD_OUT), jnp.float32).at[:, :n_out].set(b_fused)
    return w_pad.astype(jnp.bfloat16), b_pad, n_out


def simclr_classifier_forward(x, w_bf, b_pad, n_out=2, *, tm=2048):
    """x: (B, 512, 1, 1, 1) pooled ResNet-3D features.
    w_bf/b_pad: outputs of fold_classifier_params.  Returns (B, n_out) f32 probs."""
    B = x.shape[0]
    emb = x.reshape(B, -1)          # emb.flatten(1), row-major like torch
    D = emb.shape[1]
    assert w_bf.shape == (D, _N_PAD_W)

    # --- Batch tiling: 16-row (bf16 sublane-pair) padding, balanced tiles ----
    bp = _round_up(B, 16)
    if bp >= 32:
        # >=2 equal tiles so both v7x TensorCores get work; more tiles only if
        # a tile would otherwise exceed tm.
        n_tiles = max(2, _cdiv(bp, tm))
    else:
        n_tiles = 1
    tile_m = _round_up(_cdiv(bp, n_tiles), 16)
    bp = n_tiles * tile_m

    # Pad the batch directly in bf16: one HBM pass, half the bytes of f32.
    x_bf = jnp.zeros((bp, D), jnp.bfloat16).at[:B].set(emb.astype(jnp.bfloat16))

    cost = pl.CostEstimate(
        flops=2 * bp * D * _N_PAD_W,
        transcendentals=bp * _N_PAD_OUT,
        bytes_accessed=bp * D * 2 + D * _N_PAD_W * 2 + bp * _N_PAD_OUT * 2,
    )

    out = pl.pallas_call(
        _classifier_kernel,
        out_shape=jax.ShapeDtypeStruct((bp, _N_PAD_OUT), jnp.bfloat16),
        grid=(n_tiles,),
        in_specs=[
            pl.BlockSpec((tile_m, D), lambda i: (i, 0)),        # batch tile (pipelined)
            pl.BlockSpec((D, _N_PAD_W), lambda i: (0, 0)),      # fused weight (resident)
            pl.BlockSpec((1, _N_PAD_OUT), lambda i: (0, 0)),    # fused bias   (resident)
        ],
        out_specs=pl.BlockSpec((tile_m, _N_PAD_OUT), lambda i: (i, 0)),
        compiler_params=pltpu.CompilerParams(
            dimension_semantics=("parallel",),  # shard batch axis across TCs (v7x)
        ),
        cost_estimate=cost,
    )(x_bf, w_bf, b_pad)

    # Strip batch/lane padding; real class scores are columns [:n_out].
    return out[:B, :n_out].astype(jnp.float32)


def _init_params(key):
    """Deterministic synthetic params for the classifier head (nn.Linear-like)."""
    k1, k2, k3, k4 = jax.random.split(key, 4)
    lim1 = 1.0 / jnp.sqrt(512.0)
    lim2 = 1.0 / jnp.sqrt(256.0)
    w1 = jax.random.uniform(k1, (512, 256), jnp.float32, -lim1, lim1)
    b1 = jax.random.uniform(k2, (1, 256), jnp.float32, -lim1, lim1)
    w2 = jax.random.uniform(k3, (256, 2), jnp.float32, -lim2, lim2)
    b2 = jax.random.uniform(k4, (1, 2), jnp.float32, -lim2, lim2)
    return w1, b1, w2, b2


if __name__ == "__main__":
    key = jax.random.PRNGKey(0)
    k_x, k_p = jax.random.split(key)

    B = 2
    # Pooled embedding tensor from the (frozen) ResNet-3D trunk: (B, 512, 1, 1, 1)
    x = jax.random.normal(k_x, (B, 512, 1, 1, 1), jnp.float32)
    w1, b1, w2, b2 = _init_params(k_p)

    # Fold / pad / cast once (parameter-load time), then run the kernel.
    w_bf, b_pad, n_out = fold_classifier_params(w1, b1, w2, b2)
    out = simclr_classifier_forward(x, w_bf, b_pad, n_out)
    out = jax.block_until_ready(out)

    # Reference: the original un-fused f32 head (Dropout == identity in eval).
    emb = x.reshape(B, -1)
    ref = jax.nn.sigmoid((emb @ w1 + b1) @ w2 + b2)
    assert out.shape == (B, 2)
    # bf16 operands + bf16 output quantization keep probs within ~5e-3 of f32.
    assert jnp.allclose(out, ref, atol=2e-2), float(jnp.max(jnp.abs(out - ref)))

    print("KERNEL_OK")
</pallas_src>

<mosaic_0001>
module attributes {stable_mosaic.version = 11 : i64} {
  func.func @_classifier_kernel(%arg0: i32, %arg1: memref<16x512xbf16, #tpu.memory_space<vmem>>, %arg2: memref<512x128xbf16, #tpu.memory_space<vmem>>, %arg3: memref<1x8xf32, #tpu.memory_space<vmem>>, %arg4: memref<16x8xbf16, #tpu.memory_space<vmem>>) attributes {dimension_semantics = [#tpu.dimension_semantics<parallel>], iteration_bounds = array<i64: 1>, scalar_prefetch = 0 : i64, scratch_operands = 0 : i64, tpu.core_type = #tpu.core_type<tc>, window_params = [{transform_indices = @transform_0, window_bounds = array<i64: 16, 512>}, {pipeline_mode = #tpu.pipeline_mode<synchronous>, transform_indices = @transform_1, window_bounds = array<i64: 512, 128>}, {pipeline_mode = #tpu.pipeline_mode<synchronous>, transform_indices = @transform_2, window_bounds = array<i64: 1, 8>}, {transform_indices = @transform_3, window_bounds = array<i64: 16, 8>}]} {
    %c0 = arith.constant 0 : index
    %c0_0 = arith.constant 0 : index
    %0 = vector.load %arg1[%c0, %c0_0] : memref<16x512xbf16, #tpu.memory_space<vmem>>, vector<16x512xbf16>
    %c0_1 = arith.constant 0 : index
    %c0_2 = arith.constant 0 : index
    %1 = vector.load %arg2[%c0_1, %c0_2] : memref<512x128xbf16, #tpu.memory_space<vmem>>, vector<512x128xbf16>
    %cst = arith.constant dense<0.000000e+00> : vector<16x128xf32>
    %2 = tpu.matmul %0, %1, %cst {dimension_numbers = #tpu.dot_dimension_numbers<[1], [0], [0], [1], [0, 0, 1, 1], [], []>} : vector<16x512xbf16>, vector<512x128xbf16>, vector<16x128xf32> -> vector<16x128xf32>
    %3 = vector.extract_strided_slice %2 {offsets = [0, 0], sizes = [16, 8], strides = [1, 1]} : vector<16x128xf32> to vector<16x8xf32>
    %c0_3 = arith.constant 0 : index
    %c0_4 = arith.constant 0 : index
    %4 = vector.load %arg3[%c0_3, %c0_4] : memref<1x8xf32, #tpu.memory_space<vmem>>, vector<1x8xf32>
    %5 = vector.broadcast %4 : vector<1x8xf32> to vector<16x8xf32>
    %6 = arith.addf %3, %5 : vector<16x8xf32>
    %cst_5 = arith.constant 5.000000e-01 : f32
    %7 = vector.broadcast %cst_5 : f32 to vector<16x8xf32>
    %8 = arith.mulf %7, %6 : vector<16x8xf32>
    %9 = math.tanh %8 : vector<16x8xf32>
    %cst_6 = arith.constant 5.000000e-01 : f32
    %10 = vector.broadcast %cst_6 : f32 to vector<16x8xf32>
    %11 = arith.mulf %10, %9 : vector<16x8xf32>
    %cst_7 = arith.constant 5.000000e-01 : f32
    %12 = vector.broadcast %cst_7 : f32 to vector<16x8xf32>
    %13 = arith.addf %11, %12 : vector<16x8xf32>
    %14 = arith.truncf %13 : vector<16x8xf32> to vector<16x8xbf16>
    %c0_8 = arith.constant 0 : index
    %c0_9 = arith.constant 0 : index
    %15 = vector.load %arg4[%c0_8, %c0_9] : memref<16x8xbf16, #tpu.memory_space<vmem>>, vector<16x8xbf16>
    tpu.vector_store %arg4[%c0_8, %c0_9], %14 {strides = array<i32>} : memref<16x8xbf16, #tpu.memory_space<vmem>>, vector<16x8xbf16>,
    return
  }
  func.func @transform_0(%arg0: i32) -> (i32, i32) {
    %c0_i32 = arith.constant 0 : i32
    %c0_i32_0 = arith.constant 0 : i32
    return %arg0, %c0_i32 : i32, i32
  }
  func.func @transform_1(%arg0: i32) -> (i32, i32) {
    %c0_i32 = arith.constant 0 : i32
    %c0_i32_0 = arith.constant 0 : i32
    %c0_i32_1 = arith.constant 0 : i32
    return %c0_i32, %c0_i32_0 : i32, i32
  }
  func.func @transform_2(%arg0: i32) -> (i32, i32) {
    %c0_i32 = arith.constant 0 : i32
    %c0_i32_0 = arith.constant 0 : i32
    %c0_i32_1 = arith.constant 0 : i32
    return %c0_i32, %c0_i32_0 : i32, i32
  }
  func.func @transform_3(%arg0: i32) -> (i32, i32) {
    %c0_i32 = arith.constant 0 : i32
    %c0_i32_0 = arith.constant 0 : i32
    return %arg0, %c0_i32 : i32, i32
  }
}

</mosaic_0001>

<bundles_post_ra>
// kernel: tpu_custom_call.1
= control target key start
LH: loop header
LB: loop body
LE: loop exit
PB: predicated region body
PF: predicated region fallthrough
CT: control target
= control target key end

     0   :  { %8 = vsyncpa [#allocation3], 0  ;;  %s657_s0 = inlined_call_operand.hbm [shape: bf16[16,512], index: 0, kind: input, shape index: {}]   ;;  %s658_s1 = inlined_call_operand.hbm [shape: bf16[512,128], index: 1, kind: input, shape index: {}]   ;;  %s659_s2 = inlined_call_operand.vmem [shape: f32[1,8], index: 2, kind: input, shape index: {}]   ;;  %s660_s3 = inlined_call_operand.vmem [shape: bf16[16,8], index: 3, kind: output, shape index: {}]  }
   0x1   :  { %9 = vsyncpa [#allocation5], 0  ;;  %s616_s12 = smov [#allocation2]  }
   0x2   :  { %s15_s13 = sshll.u32 %s616_s12, 4  ;;  %s16_s13 = int_to_ptr.vmem [resolvable:$true] %s15_s13 }
   0x3   :  { %s580_s14 = scalar_lea.vmem %s16_s13, 512  ;;  %p585_p1 = scmp.lt.s32.totalorder %s16_s13, %s16_s13 }
   0x4   :  { %p581_p0 = scmp.ne.s32.totalorder %s16_s13, %s580_s14  ;;  %p586_p2 = scmp.lt.s32.totalorder %s580_s14, %s580_s14 }
   0x6   :  { %p587_p3 = por %p586_p2, %p585_p1 }
   0x8   :  { %p588_p4 = pnand %p587_p3, %p581_p0 }
   0xa   :  { %591 = shalt.err (!%p588_p4)
}
   0xb   :  { %s617_s15 = smov 256   ;;  %s618_s16 = smov 16  }
   0xc   :  { %21 = dma.hbm_to_vmem [thread:$0]  %s657_s0, 512, %s16_s13, [#allocation3], %s617_s15, %s617_s15, %s618_s16  }
   0xd   :  { %s619_s19 = smov [#allocation4]  }
   0xe   :  { %s27_s20 = sshll.u32 %s619_s19, 4  ;;  %s28_s20 = int_to_ptr.vmem [resolvable:$true] %s27_s20 }
   0xf   :  { %s600_s21 = scalar_lea.vmem %s28_s20, 4096  ;;  %p605_p6 = scmp.lt.s32.totalorder %s28_s20, %s28_s20 }
  0x10   :  { %p601_p5 = scmp.ne.s32.totalorder %s28_s20, %s600_s21  ;;  %p606_p7 = scmp.lt.s32.totalorder %s600_s21, %s600_s21 }
  0x12   :  { %p607_p8 = por %p606_p7, %p605_p6 }
  0x14   :  { %p608_p9 = pnand %p607_p8, %p601_p5 }
  0x16   :  { %611 = shalt.err (!%p608_p9)
}
  0x17   :  { %s620_s22 = smov 64   ;;  %s621_s23 = smov 4  }
  0x18   :  { %33 = dma.hbm_to_vmem [thread:$0]  %s658_s1, 4096, %s28_s20, [#allocation5], %s620_s22, %s620_s22, %s621_s23  }
  0x19   :  { %612 = dma.done.wait [#allocation3], 512  }
  0x1a   :  { %613 = vsyncadd [#allocation3], 4294966784 }
  0x1b   :  { %614 = dma.done.wait [#allocation5], 4096  }
  0x1c   :  { %615 = vsyncadd [#allocation5], 4294963200  ;;  %v530_v0 = vld [vmem:[#allocation4 + $0x78] sm:$0xff]   ;;  %v534_v4 = vld [vmem:[#allocation4 + $0x70] sm:$0xff]   ;;  %vm430_vm0 = vcmask 60416  }
  0x1d   :  { %v531_v1 = vld [vmem:[#allocation4 + $0xf8] sm:$0xff]   ;;  %480 = vmatprep.subr.bf16.mxu0 %v530_v0  ;;  %v535_v5 = vld [vmem:[#allocation4 + $0xf0] sm:$0xff]   ;;  %v538_v8 = vld [vmem:[#allocation4 + $0x68] sm:$0xff]  }
  0x1e   :  { %v532_v2 = vld [vmem:[#allocation4 + $0x38] sm:$0xff]   ;;  %502 = vmatprep.subr.bf16.mxu1 %v531_v1  ;;  %v536_v6 = vld [vmem:[#allocation4 + $0x30] sm:$0xff]   ;;  %v539_v9 = vld [vmem:[#allocation4 + $0xe8] sm:$0xff]  }
  0x1f   :  { %v533_v3 = vld [vmem:[#allocation4 + $0xb8] sm:$0xff]   ;;  %481 = vmatpush3.bf16.msra.mxu0 %v532_v2  ;;  %v537_v7 = vld [vmem:[#allocation4 + $0xb0] sm:$0xff]   ;;  %v540_v10 = vld [vmem:[#allocation4 + $0x28] sm:$0xff]  }
  0x20   :  { %503 = vmatpush3.bf16.msra.mxu1 %v533_v3  ;;  %482 = vmatprep.subr.bf16.mxu0 %v534_v4  ;;  %v541_v11 = vld [vmem:[#allocation4 + $0xa8] sm:$0xff]   ;;  %v542_v12 = vld [vmem:[#allocation4 + $0x60] sm:$0xff]   ;;  %v546_v16 = vld [vmem:[#allocation4 + $0x58] sm:$0xff]  }
  0x21   :  { %504 = vmatprep.subr.bf16.mxu1 %v535_v5  ;;  %v543_v13 = vld [vmem:[#allocation4 + $0xe0] sm:$0xff]   ;;  %v547_v17 = vld [vmem:[#allocation4 + $0xd8] sm:$0xff]   ;;  %v550_v20 = vld [vmem:[#allocation4 + $0x50] sm:$0xff]  }
  0x22   :  { %v544_v14 = vld [vmem:[#allocation4 + $0x20] sm:$0xff]   ;;  %v548_v18 = vld [vmem:[#allocation4 + $0x18] sm:$0xff]   ;;  %v551_v21 = vld [vmem:[#allocation4 + $0xd0] sm:$0xff]  }
  0x23   :  { %483 = vmatpush3.bf16.msra.mxu0 %v536_v6  ;;  %v545_v15 = vld [vmem:[#allocation4 + $0xa0] sm:$0xff]   ;;  %v549_v19 = vld [vmem:[#allocation4 + $0x98] sm:$0xff]   ;;  %v552_v22 = vld [vmem:[#allocation4 + $0x10] sm:$0xff]  }
  0x24   :  { %505 = vmatpush3.bf16.msra.mxu1 %v537_v7  ;;  %484 = vmatprep.subr.bf16.mxu0 %v538_v8  ;;  %v553_v23 = vld [vmem:[#allocation4 + $0x90] sm:$0xff]   ;;  %v554_v24 = vld [vmem:[#allocation4 + $0x48] sm:$0xff]   ;;  %v558_v28 = vld [vmem:[#allocation4 + $0x40] sm:$0xff]  }
  0x25   :  { %506 = vmatprep.subr.bf16.mxu1 %v539_v9  ;;  %v555_v25 = vld [vmem:[#allocation4 + $0xc8] sm:$0xff]   ;;  %v559_v29 = vld [vmem:[#allocation4 + $0xc0] sm:$0xff]  }
  0x26   :  { %v556_v26 = vld [vmem:[#allocation4 + $0x8] sm:$0xff]   ;;  %v560_v30 = vld [vmem:[#allocation4] sm:$0xff]  }
  0x27   :  { %485 = vmatpush3.bf16.msra.mxu0 %v540_v10  ;;  %v557_v27 = vld [vmem:[#allocation4 + $0x88] sm:$0xff]   ;;  %v561_v31 = vld [vmem:[#allocation4 + $0x80] sm:$0xff]  }
  0x28   :  { %507 = vmatpush3.bf16.msra.mxu1 %v541_v11  ;;  %486 = vmatprep.subr.bf16.mxu0 %v542_v12  ;;  %v562_v32 = vld [vmem:[#allocation2] ss:$16 sps:$4 sm:$0xff]   ;;  %v564_v33 = vld [vmem:[#allocation2 + $0x4] ss:$16 sps:$4 sm:$0xff]   ;;  %v565_v34 = vld [vmem:[#allocation2 + $0x8] ss:$16 sps:$4 sm:$0xff]  }
  0x29   :  { %508 = vmatprep.subr.bf16.mxu1 %v543_v13  ;;  %v567_v35 = vld [vmem:[#allocation2 + $0xc] ss:$16 sps:$4 sm:$0xff]   ;;  %355 = vmatprep.mubr.bf16.mxu0 %v564_v33  ;;  %v475_v43 = vld [vmem:[%s659_s2] ss:$0 sm:$0xff] }
  0x2a   :  { %396 = vmatprep.mubr.bf16.mxu1 %v567_v35 }
  0x2b   :  { %487 = vmatpush3.bf16.msra.mxu0 %v544_v14 }
  0x2c   :  { %509 = vmatpush3.bf16.msra.mxu1 %v545_v15  ;;  %488 = vmatprep.subr.bf16.mxu0 %v546_v16 }
  0x2d   :  { %510 = vmatprep.subr.bf16.mxu1 %v547_v17 }
  0x2f   :  { %489 = vmatpush3.bf16.msra.mxu0 %v548_v18 }
  0x30   :  { %511 = vmatpush3.bf16.msra.mxu1 %v549_v19  ;;  %490 = vmatprep.subr.bf16.mxu0 %v550_v20 }
  0x31   :  { %512 = vmatprep.subr.bf16.mxu1 %v551_v21 }
  0x33   :  { %491 = vmatpush3.bf16.msra.mxu0 %v552_v22 }
  0x34   :  { %513 = vmatpush3.bf16.msra.mxu1 %v553_v23  ;;  %492 = vmatprep.subr.bf16.mxu0 %v554_v24 }
  0x35   :  { %514 = vmatprep.subr.bf16.mxu1 %v555_v25 }
  0x37   :  { %493 = vmatpush3.bf16.msra.mxu0 %v556_v26 }
  0x38   :  { %515 = vmatpush3.bf16.msra.mxu1 %v557_v27  ;;  %494 = vmatprep.subr.bf16.mxu0 %v558_v28 }
  0x39   :  { %516 = vmatprep.subr.bf16.mxu1 %v559_v29 }
  0x3b   :  { %495 = vmatpush3.bf16.msra.mxu0 %v560_v30 }
  0x3c   :  { %517 = vmatpush3.bf16.msra.mxu1 %v561_v31 }
  0x3e   :  { %356 = vmatmul.mubr.bf16.vlgmr.msra.gmra.mxu0 %v562_v32 }
  0x3f   :  { %397 = vmatmul.mubr.bf16.vlgmr.msra.gmra.mxu1 %v565_v34 }
  0xfe   :  { %v496_v36 = vpop.f32.mrf.mxu0 }
  0xff   :  { %v518_v37 = vpop.f32.mrf.mxu1 }
 0x100   :  { %v497_v38 = vpop.f32.mrf.mxu0 }
 0x101   :  { %v498_v39 = vadd.f32 %v497_v38, %v496_v36  ;;  %v519_v40 = vpop.f32.mrf.mxu1 }
 0x102   :  { %v520_v41 = vadd.f32 %v519_v40, %v518_v37  ;;  %v499_v42 = vpop.f32.mrf.mxu0 }
 0x103   :  { %v521_v44 = vpop.f32.mrf.mxu1 }
 0x104   :  { %v399_v45 = vadd.f32 %v520_v41, %v498_v39  ;;  %v500_v46 = vpop.f32.mrf.mxu0 }
 0x105   :  { %v501_v47 = vadd.f32 %v500_v46, %v499_v42  ;;  %v522_v48 = vpop.f32.mrf.mxu1 }
 0x106   :  { %v412_v49 = vadd.f32 %v475_v43, %v399_v45  ;;  %v523_v50 = vadd.f32 %v522_v48, %v521_v44 }
 0x108   :  { %v414_v51 = vmul.f32 0.5, %v412_v49  ;;  %v402_v52 = vadd.f32 %v523_v50, %v501_v47 }
 0x10a   :  { %568 = vtanh.f32 %v414_v51  ;;  %v413_v53 = vadd.f32 %v475_v43, %v402_v52 }
 0x10c   :  { %v415_v54 = vmul.f32 0.5, %v413_v53 }
 0x10e   :  { %570 = vtanh.f32 %v415_v54 }
 0x117   :  { %v569_v55 = vpop.eup %568 }
 0x118   :  { %v418_v56 = vmul.f32 0.5, %v569_v55 }
 0x11a   :  { %v420_v57 = vadd.f32 0.5, %v418_v56 }
 0x11b   :  { %v571_v58 = vpop.eup %570 }
 0x11c   :  { %v478_v59 = vpack.c.bf16 %v420_v57, %v420_v57  ;;  %v419_v60 = vmul.f32 0.5, %v571_v58 }
 0x11e   :  { %431 = vst.msk [vmem:[%s660_s3] sm:$0xf] %vm430_vm0, %v478_v59  ;;  %v421_v61 = vadd.f32 0.5, %v419_v60 }
 0x120   :  { %v479_v62 = vpack.c.bf16 %v421_v61, %v421_v61 }
 0x122   :  { %432 = vst.msk [vmem:[%s660_s3 + $0x4] sm:$0xf] %vm430_vm0, %v479_v62 }
 0x123   :  { %437 = vsyncpa [#allocation3], 1 }
 0x124   :  { %438 = vsyncpa [#allocation5], 1 }

</bundles_post_ra>
